<compile_context>
chip_gen: v7x
topology: tpu7x:2x2x1
jax: 0.10.0
libtpu: 0.0.40
codegen_flags: <defaults>
</compile_context>

<pallas_src>
import jax
import jax.numpy as jnp
from jax.experimental import pallas as pl
from jax.experimental.pallas import tpu as pltpu

LEN_GAME_STATE = 32   # constant is undefined in the source module; 32 chosen
OUT_DIM = 9


def _round_up(n, m):
    return ((n + m - 1) // m) * m


def mlp_kernel(x_ref, w1_ref, b1_ref, w2_ref, b2_ref, w3_ref, b3_ref, o_ref):
    # One batch tile per grid step; all three layers fused in VMEM, f32 MXU acc.
    x = x_ref[...]                                               # (TB, D)
    h = jnp.dot(x, w1_ref[...],
                preferred_element_type=jnp.float32) + b1_ref[...]
    h = jnp.maximum(h, 0.0)                                      # (TB, D)
    h = jnp.dot(h, w2_ref[...],
                preferred_element_type=jnp.float32) + b2_ref[...]
    h = jnp.maximum(h, 0.0)                                      # (TB, D)
    h = jnp.dot(h, w3_ref[...],
                preferred_element_type=jnp.float32) + b3_ref[...]
    o_ref[...] = jnp.maximum(h, 0.0)                             # (TB, 9) narrow store


def runner_module_forward(x, params, *, tb=1024):
    """Batched fused MLP: y = relu(relu(relu(x@W1+b1)@W2+b2)@W3+b3).

    Weights are stored as [in, out] (transposed vs. PyTorch's [out, in]), so
    the kernel computes x @ W + b == PyTorch's x @ W.T + b.
    """
    w1, b1, w2, b2, w3, b3 = params
    B, D = x.shape
    out_dim = w3.shape[1]

    # Pad the batch only up to a sublane multiple (8).  For typical batches
    # (already a multiple of 8) this is a no-op; worst case adds 7 rows.
    B8 = _round_up(B, 8)
    x_in = x if B8 == B else jnp.pad(x, ((0, B8 - B), (0, 0)))

    # Batch tile: large enough to amortize per-step overhead (~0.35 us), small
    # enough that the grid has >= 2 steps so both v7x TensorCores get work.
    # Always a multiple of 8 and never larger than the (padded) batch.
    TB = max(8, min(tb, _round_up(pl.cdiv(B8, 2), 8)))
    grid = (pl.cdiv(B8, TB),)          # ragged last block handled by Pallas

    out = pl.pallas_call(
        mlp_kernel,
        out_shape=jax.ShapeDtypeStruct((B8, out_dim), jnp.float32),
        grid=grid,
        in_specs=[
            pl.BlockSpec((TB, D), lambda i: (i, 0)),         # x: streamed per step
            pl.BlockSpec((D, D), lambda i: (0, 0)),          # w1: VMEM-resident
            pl.BlockSpec((1, D), lambda i: (0, 0)),          # b1
            pl.BlockSpec((D, D), lambda i: (0, 0)),          # w2
            pl.BlockSpec((1, D), lambda i: (0, 0)),          # b2
            pl.BlockSpec((D, out_dim), lambda i: (0, 0)),    # w3 (32, 9)
            pl.BlockSpec((1, out_dim), lambda i: (0, 0)),    # b3 (1, 9)
        ],
        out_specs=pl.BlockSpec((TB, out_dim), lambda i: (i, 0)),
        compiler_params=pltpu.CompilerParams(
            dimension_semantics=("parallel",),   # batch axis shards across v7x TCs
        ),
    )(x_in, w1, b1, w2, b2, w3, b3)

    return out if B8 == B else out[:B]


def init_params(key, d=LEN_GAME_STATE, out_dim=OUT_DIM):
    """Deterministic init mimicking nn.Linear's uniform(-1/sqrt(fan_in), 1/sqrt(fan_in))."""
    ks = jax.random.split(key, 6)

    def lin(kw, kb, fan_in, fan_out):
        bound = 1.0 / jnp.sqrt(fan_in)
        # stored as [in, out] (transposed relative to PyTorch's [out, in])
        w = jax.random.uniform(kw, (fan_in, fan_out), jnp.float32, -bound, bound)
        b = jax.random.uniform(kb, (1, fan_out), jnp.float32, -bound, bound)
        return w, b

    w1, b1 = lin(ks[0], ks[1], d, d)
    w2, b2 = lin(ks[2], ks[3], d, d)
    w3, b3 = lin(ks[4], ks[5], d, out_dim)
    return (w1, b1, w2, b2, w3, b3)


def reference_forward(x, params):
    w1, b1, w2, b2, w3, b3 = params
    h = jnp.maximum(x @ w1 + b1, 0.0)
    h = jnp.maximum(h @ w2 + b2, 0.0)
    return jnp.maximum(h @ w3 + b3, 0.0)


if __name__ == "__main__":
    key = jax.random.PRNGKey(0)
    k_x, k_x2, k_p = jax.random.split(key, 3)
    params = init_params(k_p)

    # Small single-shot case (batch=2): batch padded to one 8-row tile.
    batch = 2
    x = jax.random.normal(k_x, (batch, LEN_GAME_STATE), jnp.float32)
    out = jax.block_until_ready(runner_module_forward(x, params))
    ref = reference_forward(x, params)
    assert out.shape == (batch, OUT_DIM), out.shape
    assert jnp.allclose(out, ref, atol=1e-5, rtol=1e-5), "mismatch vs reference (B=2)"

    # Batched case exercising a multi-step grid with a ragged last block.
    batch2 = 260
    x2 = jax.random.normal(k_x2, (batch2, LEN_GAME_STATE), jnp.float32)
    out2 = jax.block_until_ready(runner_module_forward(x2, params))
    ref2 = reference_forward(x2, params)
    assert out2.shape == (batch2, OUT_DIM), out2.shape
    assert jnp.allclose(out2, ref2, atol=1e-5, rtol=1e-5), "mismatch vs reference (B=260)"

    print("KERNEL_OK")
</pallas_src>

<mosaic_0001>
module attributes {stable_mosaic.version = 11 : i64} {
  func.func @mlp_kernel(%arg0: i32, %arg1: memref<8x32xf32, #tpu.memory_space<vmem>>, %arg2: memref<32x32xf32, #tpu.memory_space<vmem>>, %arg3: memref<1x32xf32, #tpu.memory_space<vmem>>, %arg4: memref<32x32xf32, #tpu.memory_space<vmem>>, %arg5: memref<1x32xf32, #tpu.memory_space<vmem>>, %arg6: memref<32x9xf32, #tpu.memory_space<vmem>>, %arg7: memref<1x9xf32, #tpu.memory_space<vmem>>, %arg8: memref<8x9xf32, #tpu.memory_space<vmem>>) attributes {dimension_semantics = [#tpu.dimension_semantics<parallel>], iteration_bounds = array<i64: 1>, scalar_prefetch = 0 : i64, scratch_operands = 0 : i64, tpu.core_type = #tpu.core_type<tc>, window_params = [{transform_indices = @transform_0, window_bounds = array<i64: 8, 32>}, {pipeline_mode = #tpu.pipeline_mode<synchronous>, transform_indices = @transform_1, window_bounds = array<i64: 32, 32>}, {pipeline_mode = #tpu.pipeline_mode<synchronous>, transform_indices = @transform_2, window_bounds = array<i64: 1, 32>}, {pipeline_mode = #tpu.pipeline_mode<synchronous>, transform_indices = @transform_3, window_bounds = array<i64: 32, 32>}, {pipeline_mode = #tpu.pipeline_mode<synchronous>, transform_indices = @transform_4, window_bounds = array<i64: 1, 32>}, {pipeline_mode = #tpu.pipeline_mode<synchronous>, transform_indices = @transform_5, window_bounds = array<i64: 32, 9>}, {pipeline_mode = #tpu.pipeline_mode<synchronous>, transform_indices = @transform_6, window_bounds = array<i64: 1, 9>}, {transform_indices = @transform_7, window_bounds = array<i64: 8, 9>}]} {
    %c0 = arith.constant 0 : index
    %c0_0 = arith.constant 0 : index
    %0 = vector.load %arg1[%c0, %c0_0] : memref<8x32xf32, #tpu.memory_space<vmem>>, vector<8x32xf32>
    %c0_1 = arith.constant 0 : index
    %c0_2 = arith.constant 0 : index
    %1 = vector.load %arg2[%c0_1, %c0_2] : memref<32x32xf32, #tpu.memory_space<vmem>>, vector<32x32xf32>
    %cst = arith.constant dense<0.000000e+00> : vector<8x32xf32>
    %2 = tpu.matmul %0, %1, %cst {dimension_numbers = #tpu.dot_dimension_numbers<[1], [0], [0], [1], [0, 0, 1, 1], [], []>} : vector<8x32xf32>, vector<32x32xf32>, vector<8x32xf32> -> vector<8x32xf32>
    %c0_3 = arith.constant 0 : index
    %c0_4 = arith.constant 0 : index
    %3 = vector.load %arg3[%c0_3, %c0_4] : memref<1x32xf32, #tpu.memory_space<vmem>>, vector<1x32xf32>
    %4 = vector.broadcast %3 : vector<1x32xf32> to vector<8x32xf32>
    %5 = arith.addf %2, %4 : vector<8x32xf32>
    %cst_5 = arith.constant 0.000000e+00 : f32
    %6 = vector.broadcast %cst_5 : f32 to vector<8x32xf32>
    %7 = arith.maximumf %5, %6 : vector<8x32xf32>
    %c0_6 = arith.constant 0 : index
    %c0_7 = arith.constant 0 : index
    %8 = vector.load %arg4[%c0_6, %c0_7] : memref<32x32xf32, #tpu.memory_space<vmem>>, vector<32x32xf32>
    %cst_8 = arith.constant dense<0.000000e+00> : vector<8x32xf32>
    %9 = tpu.matmul %7, %8, %cst_8 {dimension_numbers = #tpu.dot_dimension_numbers<[1], [0], [0], [1], [0, 0, 1, 1], [], []>} : vector<8x32xf32>, vector<32x32xf32>, vector<8x32xf32> -> vector<8x32xf32>
    %c0_9 = arith.constant 0 : index
    %c0_10 = arith.constant 0 : index
    %10 = vector.load %arg5[%c0_9, %c0_10] : memref<1x32xf32, #tpu.memory_space<vmem>>, vector<1x32xf32>
    %11 = vector.broadcast %10 : vector<1x32xf32> to vector<8x32xf32>
    %12 = arith.addf %9, %11 : vector<8x32xf32>
    %cst_11 = arith.constant 0.000000e+00 : f32
    %13 = vector.broadcast %cst_11 : f32 to vector<8x32xf32>
    %14 = arith.maximumf %12, %13 : vector<8x32xf32>
    %c0_12 = arith.constant 0 : index
    %c0_13 = arith.constant 0 : index
    %15 = vector.load %arg6[%c0_12, %c0_13] : memref<32x9xf32, #tpu.memory_space<vmem>>, vector<32x9xf32>
    %cst_14 = arith.constant dense<0.000000e+00> : vector<8x9xf32>
    %16 = tpu.matmul %14, %15, %cst_14 {dimension_numbers = #tpu.dot_dimension_numbers<[1], [0], [0], [1], [0, 0, 1, 1], [], []>} : vector<8x32xf32>, vector<32x9xf32>, vector<8x9xf32> -> vector<8x9xf32>
    %c0_15 = arith.constant 0 : index
    %c0_16 = arith.constant 0 : index
    %17 = vector.load %arg7[%c0_15, %c0_16] : memref<1x9xf32, #tpu.memory_space<vmem>>, vector<1x9xf32>
    %18 = vector.broadcast %17 : vector<1x9xf32> to vector<8x9xf32>
    %19 = arith.addf %16, %18 : vector<8x9xf32>
    %cst_17 = arith.constant 0.000000e+00 : f32
    %20 = vector.broadcast %cst_17 : f32 to vector<8x9xf32>
    %21 = arith.maximumf %19, %20 : vector<8x9xf32>
    %c0_18 = arith.constant 0 : index
    %c0_19 = arith.constant 0 : index
    %22 = vector.load %arg8[%c0_18, %c0_19] : memref<8x9xf32, #tpu.memory_space<vmem>>, vector<8x9xf32>
    tpu.vector_store %arg8[%c0_18, %c0_19], %21 {strides = array<i32>} : memref<8x9xf32, #tpu.memory_space<vmem>>, vector<8x9xf32>,
    return
  }
  func.func @transform_0(%arg0: i32) -> (i32, i32) {
    %c0_i32 = arith.constant 0 : i32
    %c0_i32_0 = arith.constant 0 : i32
    return %arg0, %c0_i32 : i32, i32
  }
  func.func @transform_1(%arg0: i32) -> (i32, i32) {
    %c0_i32 = arith.constant 0 : i32
    %c0_i32_0 = arith.constant 0 : i32
    %c0_i32_1 = arith.constant 0 : i32
    return %c0_i32, %c0_i32_0 : i32, i32
  }
  func.func @transform_2(%arg0: i32) -> (i32, i32) {
    %c0_i32 = arith.constant 0 : i32
    %c0_i32_0 = arith.constant 0 : i32
    %c0_i32_1 = arith.constant 0 : i32
    return %c0_i32, %c0_i32_0 : i32, i32
  }
  func.func @transform_3(%arg0: i32) -> (i32, i32) {
    %c0_i32 = arith.constant 0 : i32
    %c0_i32_0 = arith.constant 0 : i32
    %c0_i32_1 = arith.constant 0 : i32
    return %c0_i32, %c0_i32_0 : i32, i32
  }
  func.func @transform_4(%arg0: i32) -> (i32, i32) {
    %c0_i32 = arith.constant 0 : i32
    %c0_i32_0 = arith.constant 0 : i32
    %c0_i32_1 = arith.constant 0 : i32
    return %c0_i32, %c0_i32_0 : i32, i32
  }
  func.func @transform_5(%arg0: i32) -> (i32, i32) {
    %c0_i32 = arith.constant 0 : i32
    %c0_i32_0 = arith.constant 0 : i32
    %c0_i32_1 = arith.constant 0 : i32
    return %c0_i32, %c0_i32_0 : i32, i32
  }
  func.func @transform_6(%arg0: i32) -> (i32, i32) {
    %c0_i32 = arith.constant 0 : i32
    %c0_i32_0 = arith.constant 0 : i32
    %c0_i32_1 = arith.constant 0 : i32
    return %c0_i32, %c0_i32_0 : i32, i32
  }
  func.func @transform_7(%arg0: i32) -> (i32, i32) {
    %c0_i32 = arith.constant 0 : i32
    %c0_i32_0 = arith.constant 0 : i32
    return %arg0, %c0_i32 : i32, i32
  }
}

</mosaic_0001>

<bundles_post_ra>
// kernel: tpu_custom_call.1
= control target key start
LH: loop header
LB: loop body
LE: loop exit
PB: predicated region body
PF: predicated region fallthrough
CT: control target
= control target key end

     0   :  { %12 = vsyncpa [#allocation3], 0  ;;  %s555_s0 = inlined_call_operand.vmem [shape: f32[8,32], index: 0, kind: input, shape index: {}]   ;;  %s556_s1 = inlined_call_operand.vmem [shape: f32[32,32], index: 1, kind: input, shape index: {}]   ;;  %s557_s2 = inlined_call_operand.vmem [shape: f32[1,32], index: 2, kind: input, shape index: {}]   ;;  %s558_s3 = inlined_call_operand.hbm [shape: f32[32,32], index: 3, kind: input, shape index: {}]   ;;  %s559_s4 = inlined_call_operand.vmem [shape: f32[1,32], index: 4, kind: input, shape index: {}]   ;;  %s560_s5 = inlined_call_operand.vmem [shape: f32[32,9], index: 5, kind: input, shape index: {}]   ;;  %s561_s6 = inlined_call_operand.vmem [shape: f32[1,9], index: 6, kind: input, shape index: {}]   ;;  %s562_s7 = inlined_call_operand.hbm [shape: f32[8,9], index: 7, kind: output, shape index: {}]  }
   0x1   :  { %13 = vsyncpa [#allocation4], 0  ;;  %s442_s24 = smov [#allocation2]   ;;  %s394_s28 = scalar_lea.hbm %s558_s3, 512 }
   0x2   :  { %s25_s25 = sshll.u32 %s442_s24, 4  ;;  %p395_p0 = scmp.ne.s32.totalorder %s558_s3, %s394_s28  ;;  %s26_s25 = int_to_ptr.vmem [resolvable:$true] %s25_s25 }
   0x3   :  { %p398_p1 = scmp.lt.u32.totalorder %s394_s28, %s558_s3 }
   0x5   :  { %p400_p2 = pnand %p398_p1, %p395_p0 }
   0x7   :  { %403 = shalt.err (!%p400_p2)
}
   0x8   :  { %s404_s10 = scalar_lea.vmem %s26_s25, 512  ;;  %p409_p4 = scmp.lt.s32.totalorder %s26_s25, %s26_s25 }
   0x9   :  { %p405_p3 = scmp.ne.s32.totalorder %s26_s25, %s404_s10  ;;  %p410_p5 = scmp.lt.s32.totalorder %s404_s10, %s404_s10 }
   0xb   :  { %p411_p6 = por %p410_p5, %p409_p4 }
   0xd   :  { %p412_p7 = pnand %p411_p6, %p405_p3 }
   0xf   :  { %415 = shalt.err (!%p412_p7)
}
  0x10   :  { %s443_s11 = smov 128   ;;  %s444_s12 = smov 8  }
  0x11   :  { %31 = dma.hbm_to_vmem [thread:$0]  %s558_s3, 512, %s26_s25, [#allocation3], %s443_s11, %s443_s11, %s444_s12  }
  0x12   :  { %438 = dma.done.wait [#allocation3], 512  }
  0x13   :  { %439 = vsyncadd [#allocation3], 4294966784  ;;  %v445_v0 = vmov 0.0|0.0   ;;  %vm446_vm0 = vmmov 0   ;;  %v447_v1 = vmov 0.0   ;;  %v42_v2 = vld [vmem:[%s556_s1] sm:$0xff] }
  0x14   :  { %369 = vmatprep.subr.bf16.mxu0 %v445_v0  ;;  %344 = vmatprep.mubr.msk.f32.mxu0 %vm446_vm0, %v447_v1  ;;  %v43_v3 = vld [vmem:[%s556_s1 + $0x8] sm:$0xff]  ;;  %v44_v4 = vld [vmem:[%s556_s1 + $0x10] sm:$0xff]  ;;  %v45_v6 = vld [vmem:[%s556_s1 + $0x18] sm:$0xff]  ;;  %vm53_vm1 = vcmask 261120   ;;  %s448_s12 = smov [#allocation5]   ;;  %vm298_vm2 = vcmask 72704  }
  0x15   :  { %375 = vmatprep.subr.bf16.mxu1 %v445_v0  ;;  %355 = vmatprep.mubr.msk.f32.mxu1 %vm446_vm0, %v447_v1  ;;  %v370_v5 = vpack.c.bf16 %v43_v3, %v42_v2  ;;  %v128_v7 = vld [vmem:[#allocation2] sm:$0xff]  ;;  %v129_v8 = vld [vmem:[#allocation2 + $0x8] sm:$0xff]  ;;  %v373_v9 = vpack.c.bf16 %v45_v6, %v44_v4  ;;  %v130_v12 = vld [vmem:[#allocation2 + $0x10] sm:$0xff]  ;;  %s306_s13 = sshll.u32 %s448_s12, 4  ;;  %s307_s13 = int_to_ptr.vmem [resolvable:$true] %s306_s13 }
  0x16   :  { %v376_v10 = vpack.c.bf16 %v129_v8, %v128_v7  ;;  %v41_v11 = vld [vmem:[%s555_s0] sm:$0xff]  ;;  %v131_v13 = vld [vmem:[#allocation2 + $0x18] sm:$0xff]  ;;  %v214_v16 = vld [vmem:[%s560_s5 + $0x8] sm:$0xff]  ;;  %p421_p9 = scmp.lt.s32.totalorder %s307_s13, %s307_s13 }
  0x17   :  { %371 = vmatpush3.bf16.msra.mxu0 %v370_v5  ;;  %v379_v14 = vpack.c.bf16 %v131_v13, %v130_v12  ;;  %v213_v15 = vld [vmem:[%s560_s5] sm:$0xff]  ;;  %v215_v23 = vld [vmem:[%s560_s5 + $0x10] sm:$0xff]  ;;  %v216_v24 = vld [vmem:[%s560_s5 + $0x18] sm:$0xff] }
  0x18   :  { %372 = vmatprep.subr.bf16.mxu0 %v445_v0  ;;  %377 = vmatpush3.bf16.msra.mxu1 %v376_v10  ;;  %v382_v17 = vpack.c.bf16 %v214_v16, %v213_v15  ;;  %v315_v18 = vld [vmem:[%s557_s2] ss:$0 sm:$0xff]  ;;  %v385_v25 = vpack.c.bf16 %v216_v24, %v215_v23 }
  0x19   :  { %378 = vmatprep.subr.bf16.mxu1 %v445_v0  ;;  %v317_v26 = vld [vmem:[%s559_s4] ss:$0 sm:$0xff]  ;;  %s416_s4 = scalar_lea.vmem %s307_s13, 128 }
  0x1a   :  { %v319_v31 = vld [vmem:[%s561_s6] ss:$0 sm:$0xff]  ;;  %p417_p8 = scmp.ne.s32.totalorder %s307_s13, %s416_s4  ;;  %p422_p10 = scmp.lt.s32.totalorder %s416_s4, %s416_s4 }
  0x1b   :  { %374 = vmatpush3.bf16.msra.mxu0 %v373_v9 }
  0x1c   :  { %381 = vmatprep.subr.bf16.mxu0 %v445_v0  ;;  %380 = vmatpush3.bf16.msra.mxu1 %v379_v14  ;;  %p423_p11 = por %p422_p10, %p421_p9 }
  0x1e   :  { %345 = vmatmul.mubr.msk.f32.vlgmr.msra.gmra.mrb[0].mxu0 %vm53_vm1, %v41_v11  ;;  %p424_p12 = pnand %p423_p11, %p417_p8 }
  0x1f   :  { %366 = vmatprep.mubr.msk.f32.mxu0 %vm446_vm0, %v447_v1  ;;  %383 = vmatpush3.bf16.msra.mxu0 %v382_v17 }
  0x20   :  { %384 = vmatprep.subr.bf16.mxu0 %v445_v0 }
  0x23   :  { %386 = vmatpush3.bf16.msra.mxu0 %v385_v25 }
  0xf1   :  { %v123_v19 = vpop.f32.mrb[0].mxu0 }
  0xf2   :  { %v124_v20 = vadd.f32 %v315_v18, %v123_v19  ;;  %v346_v21 = vpop.f32.mrb[1].mxu0 }
  0xf4   :  { %v127_v22 = vmax.f32 %v124_v20, 0.0 }
  0xf6   :  { %356 = vmatmul.mubr.msk.f32.vlgmr.msra.gmra.mrb[0].mxu1 %vm53_vm1, %v127_v22 }
 0x1c9   :  { %v208_v27 = vpop.f32.mrb[0].mxu1 }
 0x1ca   :  { %v209_v28 = vadd.f32 %v317_v26, %v208_v27  ;;  %v357_v29 = vpop.f32.mrb[1].mxu1 }
 0x1cc   :  { %v212_v30 = vmax.f32 %v209_v28, 0.0 }
 0x1ce   :  { %367 = vmatmul.mubr.msk.f32.vlgmr.msra.gmra.mrb[2].mxu0 %vm53_vm1, %v212_v30 }
 0x2a1   :  { %v293_v32 = vpop.f32.mrb[2].mxu0 }
 0x2a2   :  { %v294_v33 = vadd.f32 %v319_v31, %v293_v32  ;;  %v368_v34 = vpop.f32.mrb[3].mxu0 }
 0x2a4   :  { %v297_v35 = vmax.f32 %v294_v33, 0.0 }
 0x2a6   :  { %299 = vst.msk [vmem:[#allocation5] sm:$0xff] %vm298_vm2, %v297_v35 }
 0x2a7   :  { %427 = shalt.err (!%p424_p12)
}
 0x2a8   :  { %s428_s6 = scalar_lea.hbm %s562_s7, 128 }
 0x2a9   :  { %p429_p13 = scmp.ne.s32.totalorder %s562_s7, %s428_s6  ;;  %p432_p0 = scmp.lt.u32.totalorder %s428_s6, %s562_s7 }
 0x2ab   :  { %p434_p1 = pnand %p432_p0, %p429_p13 }
 0x2ad   :  { %437 = shalt.err (!%p434_p1)
}
 0x2ae   :  { %309 = dma.vmem_to_hbm [thread:$0]  %s307_s13, 128, %s562_s7, [#allocation4]  }
 0x2af   :  { %440 = dma.done.wait [#allocation4], 128  }
 0x2b0   :  { %441 = vsyncadd [#allocation4], 4294967168 }
 0x2b1   :  { %313 = vsyncpa [#allocation3], 1 }
 0x2b2   :  { %314 = vsyncpa [#allocation4], 1 }

</bundles_post_ra>
